<compile_context>
chip_gen: v7x
topology: tpu7x:2x2x1
jax: 0.10.0
libtpu: 0.0.40
codegen_flags: <defaults>
</compile_context>

<pallas_src>
import jax
import jax.numpy as jnp
from jax.experimental import pallas as pl
from jax.experimental.pallas import tpu as pltpu

PACK = 4  # batch rows packed per kernel row -> output last dim = PACK*E = 128 (lane-dense)


def _meta_shift_kernel(x_ref, w1_ref, b1_ref, w2_ref, b2_ref, out_ref):
    # x_ref : (tile, PACK*K*E) bf16 -- PACK batch rows' worth of gathered user embeddings
    # w1_ref: (PACK*K*E, PACK*H) f32  block-diag of tile(w1, (K,1))/K (mean folded in)
    # w2_ref: (PACK*H,   PACK*E) f32  block-diag of w2
    x = x_ref[...].astype(jnp.float32)
    h = jnp.dot(x, w1_ref[...], preferred_element_type=jnp.float32) + b1_ref[...]
    h = jnp.maximum(h, 0.0)                                     # ReLU
    out = jnp.dot(h, w2_ref[...], preferred_element_type=jnp.float32) + b2_ref[...]
    out_ref[...] = out.astype(out_ref.dtype)


def _round_up(x, m):
    return ((x + m - 1) // m) * m


def _choose_tile_rows(packed_rows, in_row_bytes, out_row_bytes, weight_bytes,
                      *, vmem_budget_bytes=12 * 1024 * 1024, target_batch_rows=1024):
    """Pick the packed-row tile: VMEM-budgeted (2-deep pipeline buffers for the
    input/output tiles + resident weights), a multiple of 8, targeting ~1024
    original batch rows per tile, and small enough that the grid has >= 2
    parallel steps (pipelining + v7x megacore)."""
    per_row = 2 * (in_row_bytes + out_row_bytes)          # double-buffered in + out
    cap = max(8, ((vmem_budget_bytes - weight_bytes) // per_row) // 8 * 8)
    tile = min(cap, max(8, (target_batch_rows // PACK) // 8 * 8))
    tile = min(tile, _round_up(packed_rows, 8))
    while packed_rows > 8 and tile > 8 and tile * 2 > packed_rows:
        tile = max(8, (tile // 2) // 8 * 8)
    return tile


def meta_shifting_pallas(user_embs_bf16, w1, b1, w2, b2):
    """user_embs_bf16: (B, K, E) bfloat16 gathered user embeddings.
    Returns shifting_emb: (B, E) float32."""
    B, K, E = user_embs_bf16.shape
    H = w1.shape[1]

    # --- wrapper-side packing: fold mean-over-K into W1, block-diag for PACK rows ---
    w1f = (jnp.tile(w1.astype(jnp.float32), (K, 1)) / K)          # (K*E, H), mean folded in
    eye = jnp.eye(PACK, dtype=jnp.float32)
    w1_blk = jnp.kron(eye, w1f)                                   # (PACK*K*E, PACK*H)
    w2_blk = jnp.kron(eye, w2.astype(jnp.float32))                # (PACK*H,   PACK*E)
    b1_blk = jnp.tile(b1.astype(jnp.float32), PACK).reshape(1, PACK * H)
    b2_blk = jnp.tile(b2.astype(jnp.float32), PACK).reshape(1, PACK * E)

    # pad batch to a multiple of PACK, flatten (K, E), pack PACK rows per kernel row
    Bp = _round_up(B, PACK)
    x = user_embs_bf16.reshape(B, K * E)
    if Bp != B:
        x = jnp.pad(x, ((0, Bp - B), (0, 0)))
    packed_rows = Bp // PACK
    x = x.reshape(packed_rows, PACK * K * E)                      # lane-dense input slab

    in_row_bytes = PACK * K * E * x.dtype.itemsize
    out_row_bytes = PACK * E * 4
    weight_bytes = 4 * (w1_blk.size + w2_blk.size + b1_blk.size + b2_blk.size)
    tile = _choose_tile_rows(packed_rows, in_row_bytes, out_row_bytes, weight_bytes)

    rows_pad = _round_up(packed_rows, tile)
    if rows_pad != packed_rows:
        x = jnp.pad(x, ((0, rows_pad - packed_rows), (0, 0)))
    grid = (rows_pad // tile,)

    out_packed = pl.pallas_call(
        _meta_shift_kernel,
        out_shape=jax.ShapeDtypeStruct((rows_pad, PACK * E), jnp.float32),
        grid=grid,
        in_specs=[
            pl.BlockSpec((tile, PACK * K * E), lambda i: (i, 0)),
            pl.BlockSpec((PACK * K * E, PACK * H), lambda i: (0, 0)),
            pl.BlockSpec((1, PACK * H), lambda i: (0, 0)),
            pl.BlockSpec((PACK * H, PACK * E), lambda i: (0, 0)),
            pl.BlockSpec((1, PACK * E), lambda i: (0, 0)),
        ],
        out_specs=pl.BlockSpec((tile, PACK * E), lambda i: (i, 0)),
        compiler_params=pltpu.CompilerParams(
            dimension_semantics=("parallel",),
        ),
    )(x, w1_blk, b1_blk, w2_blk, b2_blk)

    # unpack (rows_pad, PACK*E) -> (rows_pad*PACK, E) and drop padding
    return out_packed.reshape(rows_pad * PACK, E)[:B]


def meta_shifting_reference(user_embs_f32, w1, b1, w2, b2):
    avg = jnp.mean(user_embs_f32, axis=1)
    h = jnp.maximum(avg @ w1 + b1, 0.0)
    return h @ w2 + b2


if __name__ == "__main__":
    key = jax.random.PRNGKey(0)
    k_emb, k_act, k_x, k_w1, k_b1, k_w2, k_b2 = jax.random.split(key, 7)

    # Synthetic sizes (args.embedding_size = 32, hidden = 16 per the module).
    B = 256          # batch (kept small; tile chooser still yields a multi-step grid)
    K = 8            # active users per item
    E = 32           # embedding_size
    H = 16           # hidden width of the shifting MLP
    NUM_USERS = 512
    NUM_ITEMS = 64
    NUM_FEATS = 4    # x columns; only x[:, 0] (item id) is used

    # Deterministic synthetic parameters / tables (no checkpoint / pickle loading).
    user_table = (jax.random.normal(k_emb, (NUM_USERS, E), dtype=jnp.float32) * 0.1
                  ).astype(jnp.bfloat16)        # bf16 embedding stream halves HBM traffic
    act_users = jax.random.randint(k_act, (NUM_ITEMS, K), 0, NUM_USERS)   # item -> K users
    x = jax.random.randint(k_x, (B, NUM_FEATS), 0, NUM_ITEMS)             # x[:, 0] = item id

    w1 = jax.random.normal(k_w1, (E, H), dtype=jnp.float32) * 0.1
    b1 = jax.random.normal(k_b1, (H,), dtype=jnp.float32) * 0.01
    w2 = jax.random.normal(k_w2, (H, E), dtype=jnp.float32) * 0.1
    b2 = jax.random.normal(k_b2, (E,), dtype=jnp.float32) * 0.01

    # Glue (host-side pickle lookup in the PyTorch module) as XLA gathers.
    item_ids = x[:, 0]                       # (B,)
    users = act_users[item_ids]              # (B, K)
    user_embs = user_table[users]            # (B, K, E) bf16

    out = meta_shifting_pallas(user_embs, w1, b1, w2, b2)
    out = jax.block_until_ready(out)

    ref = meta_shifting_reference(user_embs.astype(jnp.float32), w1, b1, w2, b2)
    assert out.shape == (B, E)
    assert jnp.allclose(out, ref, atol=1e-5, rtol=1e-5), "mismatch vs reference"

    print("KERNEL_OK")
</pallas_src>

<mosaic_0001>
module attributes {stable_mosaic.version = 11 : i64} {
  func.func @_meta_shift_kernel(%arg0: i32, %arg1: memref<32x1024xbf16, #tpu.memory_space<vmem>>, %arg2: memref<1024x64xf32, #tpu.memory_space<vmem>>, %arg3: memref<1x64xf32, #tpu.memory_space<vmem>>, %arg4: memref<64x128xf32, #tpu.memory_space<vmem>>, %arg5: memref<1x128xf32, #tpu.memory_space<vmem>>, %arg6: memref<32x128xf32, #tpu.memory_space<vmem>>) attributes {dimension_semantics = [#tpu.dimension_semantics<parallel>], iteration_bounds = array<i64: 2>, scalar_prefetch = 0 : i64, scratch_operands = 0 : i64, tpu.core_type = #tpu.core_type<tc>, window_params = [{transform_indices = @transform_0, window_bounds = array<i64: 32, 1024>}, {pipeline_mode = #tpu.pipeline_mode<synchronous>, transform_indices = @transform_1, window_bounds = array<i64: 1024, 64>}, {pipeline_mode = #tpu.pipeline_mode<synchronous>, transform_indices = @transform_2, window_bounds = array<i64: 1, 64>}, {pipeline_mode = #tpu.pipeline_mode<synchronous>, transform_indices = @transform_3, window_bounds = array<i64: 64, 128>}, {pipeline_mode = #tpu.pipeline_mode<synchronous>, transform_indices = @transform_4, window_bounds = array<i64: 1, 128>}, {transform_indices = @transform_5, window_bounds = array<i64: 32, 128>}]} {
    %c0 = arith.constant 0 : index
    %c0_0 = arith.constant 0 : index
    %0 = vector.load %arg1[%c0, %c0_0] : memref<32x1024xbf16, #tpu.memory_space<vmem>>, vector<32x1024xbf16>
    %1 = arith.extf %0 : vector<32x1024xbf16> to vector<32x1024xf32>
    %c0_1 = arith.constant 0 : index
    %c0_2 = arith.constant 0 : index
    %2 = vector.load %arg2[%c0_1, %c0_2] : memref<1024x64xf32, #tpu.memory_space<vmem>>, vector<1024x64xf32>
    %cst = arith.constant dense<0.000000e+00> : vector<32x64xf32>
    %3 = tpu.matmul %1, %2, %cst {dimension_numbers = #tpu.dot_dimension_numbers<[1], [0], [0], [1], [0, 0, 1, 1], [], []>} : vector<32x1024xf32>, vector<1024x64xf32>, vector<32x64xf32> -> vector<32x64xf32>
    %c0_3 = arith.constant 0 : index
    %c0_4 = arith.constant 0 : index
    %4 = vector.load %arg3[%c0_3, %c0_4] : memref<1x64xf32, #tpu.memory_space<vmem>>, vector<1x64xf32>
    %5 = vector.broadcast %4 : vector<1x64xf32> to vector<32x64xf32>
    %6 = arith.addf %3, %5 : vector<32x64xf32>
    %cst_5 = arith.constant 0.000000e+00 : f32
    %7 = vector.broadcast %cst_5 : f32 to vector<32x64xf32>
    %8 = arith.maximumf %6, %7 : vector<32x64xf32>
    %c0_6 = arith.constant 0 : index
    %c0_7 = arith.constant 0 : index
    %9 = vector.load %arg4[%c0_6, %c0_7] : memref<64x128xf32, #tpu.memory_space<vmem>>, vector<64x128xf32>
    %cst_8 = arith.constant dense<0.000000e+00> : vector<32x128xf32>
    %10 = tpu.matmul %8, %9, %cst_8 {dimension_numbers = #tpu.dot_dimension_numbers<[1], [0], [0], [1], [0, 0, 1, 1], [], []>} : vector<32x64xf32>, vector<64x128xf32>, vector<32x128xf32> -> vector<32x128xf32>
    %c0_9 = arith.constant 0 : index
    %c0_10 = arith.constant 0 : index
    %11 = vector.load %arg5[%c0_9, %c0_10] : memref<1x128xf32, #tpu.memory_space<vmem>>, vector<1x128xf32>
    %12 = vector.broadcast %11 : vector<1x128xf32> to vector<32x128xf32>
    %13 = arith.addf %10, %12 : vector<32x128xf32>
    %c0_11 = arith.constant 0 : index
    %c0_12 = arith.constant 0 : index
    %14 = vector.load %arg6[%c0_11, %c0_12] : memref<32x128xf32, #tpu.memory_space<vmem>>, vector<32x128xf32>
    tpu.vector_store %arg6[%c0_11, %c0_12], %13 {strides = array<i32>} : memref<32x128xf32, #tpu.memory_space<vmem>>, vector<32x128xf32>,
    return
  }
  func.func @transform_0(%arg0: i32) -> (i32, i32) {
    %c0_i32 = arith.constant 0 : i32
    %c0_i32_0 = arith.constant 0 : i32
    return %arg0, %c0_i32 : i32, i32
  }
  func.func @transform_1(%arg0: i32) -> (i32, i32) {
    %c0_i32 = arith.constant 0 : i32
    %c0_i32_0 = arith.constant 0 : i32
    %c0_i32_1 = arith.constant 0 : i32
    return %c0_i32, %c0_i32_0 : i32, i32
  }
  func.func @transform_2(%arg0: i32) -> (i32, i32) {
    %c0_i32 = arith.constant 0 : i32
    %c0_i32_0 = arith.constant 0 : i32
    %c0_i32_1 = arith.constant 0 : i32
    return %c0_i32, %c0_i32_0 : i32, i32
  }
  func.func @transform_3(%arg0: i32) -> (i32, i32) {
    %c0_i32 = arith.constant 0 : i32
    %c0_i32_0 = arith.constant 0 : i32
    %c0_i32_1 = arith.constant 0 : i32
    return %c0_i32, %c0_i32_0 : i32, i32
  }
  func.func @transform_4(%arg0: i32) -> (i32, i32) {
    %c0_i32 = arith.constant 0 : i32
    %c0_i32_0 = arith.constant 0 : i32
    %c0_i32_1 = arith.constant 0 : i32
    return %c0_i32, %c0_i32_0 : i32, i32
  }
  func.func @transform_5(%arg0: i32) -> (i32, i32) {
    %c0_i32 = arith.constant 0 : i32
    %c0_i32_0 = arith.constant 0 : i32
    return %arg0, %c0_i32 : i32, i32
  }
}

</mosaic_0001>

<bundles_post_ra>
// kernel: tpu_custom_call.1
= control target key start
LH: loop header
LB: loop body
LE: loop exit
PB: predicated region body
PF: predicated region fallthrough
CT: control target
= control target key end

     0   :  { %10 = vsyncpa [#allocation3], 0  ;;  %s2029_s0 = inlined_call_operand.vmem [shape: bf16[64,1024], index: 0, kind: input, shape index: {}]   ;;  %s2030_s1 = inlined_call_operand.vmem [shape: f32[1024,64], index: 1, kind: input, shape index: {}]   ;;  %s2031_s2 = inlined_call_operand.vmem [shape: f32[1,64], index: 2, kind: input, shape index: {}]   ;;  %s2032_s3 = inlined_call_operand.vmem [shape: f32[64,128], index: 3, kind: input, shape index: {}]   ;;  %s2033_s4 = inlined_call_operand.vmem [shape: f32[1,128], index: 4, kind: input, shape index: {}]   ;;  %s2034_s5 = inlined_call_operand.hbm [shape: f32[64,128], index: 5, kind: output, shape index: {}]  }
   0x1   :  { %12 = vsyncpa [#allocation3 + $0x1], 0  ;;  %s1470_s18 = smov 0   ;;  %s1472_s19 = smov 0  }
   0x2   :  { %s1474_s20 = smov 0   ;;  %s1476_s21 = smov 0  }
   0x3 LB: > { %s1491_s22 = sadd.s32 4294967295, %s1435_s21   ;;  %s949_s23 = sadd.s32 4294967294, %s1435_s21   ;;  %s1435_s21 = sphi %s1476_s21, %s2041_s21   ;;  %s1431_s20 = sphi %s1474_s20, %s2040_s20   ;;  %s1427_s19 = sphi %s1472_s19, %s2039_s19   ;;  %s1423_s18 = sphi %s1470_s18, %s2038_s18  }
   0x4   : > { %s1495_s24 = sadd.s32 1, %s1435_s21   ;;  %s135_s25 = sadd.s32 1, %s1431_s20 }
   0x5   : > { %s132_s26 = ssub.s32 %s1435_s21, %s1495_s24  ;;  %p145_p0 = scmp.ne.s32.totalorder %s1431_s20, %s1427_s19 }
   0x6   : > { %p133_p1 = scmp.eq.s32.totalorder %s132_s26, 0  ;;  %p146_p2 = scmp.eq.s32.totalorder %s1491_s22, 1 }
   0x7   : > { %p151_p3 = scmp.ne.s32.totalorder %s1427_s19, %s1423_s18  ;;  %p152_p4 = scmp.eq.s32.totalorder %s949_s23, 1 }
   0x8   : > { %s1506_s27 = scalar_select %p133_p1, %s1431_s20, %s135_s25  }
   0x9   : > { %p1508_p5 = por %p146_p2, %p145_p0  ;;  %p1512_p6 = por %p152_p4, %p151_p3 }
   0xa   : > { %p952_p7 = scmp.ge.s32.totalorder %s1435_s21, 1  ;;  %p192_p8 = scmp.lt.s32.totalorder %s1435_s21, 3 }
   0xc   : > { %p193_p9 = pnand %p952_p7, %p192_p8 }
   0xd   : > { %v293_v0 = vld [vmem:[%s2030_s1 + $0x80] sm:$0xff] (!%p193_p9)  ;;  %v294_v1 = vld [vmem:[%s2030_s1 + $0x88] sm:$0xff] (!%p193_p9)  ;;  %v295_v11 = vld [vmem:[%s2030_s1 + $0x90] sm:$0xff] (!%p193_p9)  ;;  %s954_s25 = sshll.u32 (!%p193_p9), %s1491_s22, 2  ;;  %vm771_vm0 = vcmask (!%p193_p9), 523264   ;;  %s969_s16 = sshll.u32 (!%p193_p9), %s1491_s22, 9 }
   0xe   : > { %196 = sbr.rel (%p193_p9) target bundleno = 543 (0x21f), region = 40  ;;  %v277_v2 = vld [vmem:[%s2030_s1] sm:$0xff] (!%p193_p9)  ;;  %v1180_v3 = vpack.c.bf16 (!%p193_p9), %v294_v1, %v293_v0  ;;  %v278_v4 = vld [vmem:[%s2030_s1 + $0x8] sm:$0xff] (!%p193_p9)  ;;  %v296_v13 = vld [vmem:[%s2030_s1 + $0x98] sm:$0xff] (!%p193_p9)  ;;  %p1593_p10 = scmp.lt.s32.totalorder (!%p193_p9), %s954_s25, 7 }
   0xf   : > { %v325_v5 = vld [vmem:[%s2030_s1 + $0x180] sm:$0xff] (!%p193_p9)  ;;  %v326_v6 = vld [vmem:[%s2030_s1 + $0x188] sm:$0xff] (!%p193_p9)  ;;  %v1182_v7 = vpack.c.bf16 (!%p193_p9), %v278_v4, %v277_v2  ;;  %v279_v14 = vld [vmem:[%s2030_s1 + $0x10] sm:$0xff] (!%p193_p9)  ;;  %v1184_v16 = vpack.c.bf16 (!%p193_p9), %v296_v13, %v295_v11  ;;  %s1986_s30 = scalar_lea.hbm (!%p193_p9), %s2034_s5, %s969_s16  ;;  %s1437_s22 = smov (!%p193_p9), [#allocation2]  }
  0x10   : > { %v1212_v8 = vpack.c.bf16 (!%p193_p9), %v326_v6, %v325_v5  ;;  %v309_v9 = vld [vmem:[%s2030_s1 + $0x100] sm:$0xff] (!%p193_p9)  ;;  %v310_v10 = vld [vmem:[%s2030_s1 + $0x108] sm:$0xff] (!%p193_p9)  ;;  %1181 = vmatprep.subr.bf16.mxu0 (!%p193_p9), %v1180_v3  ;;  %v280_v15 = vld [vmem:[%s2030_s1 + $0x18] sm:$0xff] (!%p193_p9)  ;;  %s1377_s9 = sshll.u32 (!%p193_p9), %s1437_s22, 4  ;;  %s1378_s9 = int_to_ptr.vmem [resolvable:$false] %s1377_s9 }
  0x11   : > { %v1214_v12 = vpack.c.bf16 (!%p193_p9), %v310_v10, %v309_v9  ;;  %1183 = vmatpush3.bf16.msra.mxu0 (!%p193_p9), %v1182_v7  ;;  %v1186_v17 = vpack.c.bf16 (!%p193_p9), %v280_v15, %v279_v14  ;;  %v327_v18 = vld [vmem:[%s2030_s1 + $0x190] sm:$0xff] (!%p193_p9)  ;;  %v328_v19 = vld [vmem:[%s2030_s1 + $0x198] sm:$0xff] (!%p193_p9)  ;;  %v297_v23 = vld [vmem:[%s2030_s1 + $0xa0] sm:$0xff] (!%p193_p9)  ;;  %s1379_s10 = scalar_lea.vmem (!%p193_p9), %s1378_s9, 1024 }
  0x12   : > { %1213 = vmatprep.subr.bf16.mxu1 (!%p193_p9), %v1212_v8  ;;  %v311_v20 = vld [vmem:[%s2030_s1 + $0x110] sm:$0xff] (!%p193_p9)  ;;  %v1216_v21 = vpack.c.bf16 (!%p193_p9), %v328_v19, %v327_v18  ;;  %v312_v22 = vld [vmem:[%s2030_s1 + $0x118] sm:$0xff] (!%p193_p9)  ;;  %v298_v24 = vld [vmem:[%s2030_s1 + $0xa8] sm:$0xff] (!%p193_p9)  ;;  %1185 = vmatprep.subr.bf16.mxu0 (!%p193_p9), %v1184_v16 }
  0x13   : > { %1215 = vmatpush3.bf16.msra.mxu1 (!%p193_p9), %v1214_v12  ;;  %v1218_v25 = vpack.c.bf16 (!%p193_p9), %v312_v22, %v311_v20  ;;  %v1188_v26 = vpack.c.bf16 (!%p193_p9), %v298_v24, %v297_v23  ;;  %v281_v27 = vld [vmem:[%s2030_s1 + $0x20] sm:$0xff] (!%p193_p9)  ;;  %v282_v28 = vld [vmem:[%s2030_s1 + $0x28] sm:$0xff] (!%p193_p9)  ;;  %v299_v35 = vld [vmem:[%s2030_s1 + $0xb0] sm:$0xff] (!%p193_p9) }
  0x14   : > { %v329_v29 = vld [vmem:[%s2030_s1 + $0x1a0] sm:$0xff] (!%p193_p9)  ;;  %1217 = vmatprep.subr.bf16.mxu1 (!%p193_p9), %v1216_v21  ;;  %v330_v30 = vld [vmem:[%s2030_s1 + $0x1a8] sm:$0xff] (!%p193_p9)  ;;  %v1190_v33 = vpack.c.bf16 (!%p193_p9), %v282_v28, %v281_v27  ;;  %v300_v36 = vld [vmem:[%s2030_s1 + $0xb8] sm:$0xff] (!%p193_p9) }
  0x15   : > { %v313_v31 = vld [vmem:[%s2030_s1 + $0x120] sm:$0xff]  ;;  %v314_v32 = vld [vmem:[%s2030_s1 + $0x128] sm:$0xff]  ;;  %1187 = vmatpush3.bf16.msra.mxu0 %v1186_v17  ;;  %v1220_v34 = vpack.c.bf16 %v330_v30, %v329_v29  ;;  %v283_v37 = vld [vmem:[%s2030_s1 + $0x30] sm:$0xff]  ;;  %v1192_v39 = vpack.c.bf16 %v300_v36, %v299_v35  ;;  %s2043_s25 = smov (!%p1593_p10, %s954_s25), 7 }
  0x16   : > { %1189 = vmatprep.subr.bf16.mxu0 %v1188_v26  ;;  %v1222_v38 = vpack.c.bf16 %v314_v32, %v313_v31  ;;  %v284_v40 = vld [vmem:[%s2030_s1 + $0x38] sm:$0xff]  ;;  %v331_v41 = vld [vmem:[%s2030_s1 + $0x1b0] sm:$0xff]  ;;  %v301_v46 = vld [vmem:[%s2030_s1 + $0xc0] sm:$0xff]  ;;  %s968_s26 = sshll.u32 %s2043_s25, 5 }
  0x17   : > { %1219 = vmatpush3.bf16.msra.mxu1 %v1218_v25  ;;  %v332_v42 = vld [vmem:[%s2030_s1 + $0x1b8] sm:$0xff]  ;;  %v315_v44 = vld [vmem:[%s2030_s1 + $0x130] sm:$0xff]  ;;  %v302_v47 = vld [vmem:[%s2030_s1 + $0xc8] sm:$0xff]  ;;  %v1194_v48 = vpack.c.bf16 %v284_v40, %v283_v37  ;;  %s1685_s23 = scalar_lea.vmem %s2029_s0, %s968_s26 }
  0x18   : > { %1221 = vmatprep.subr.bf16.mxu1 %v1220_v34  ;;  %v1224_v43 = vpack.c.bf16 %v332_v42, %v331_v41  ;;  %v316_v45 = vld [vmem:[%s2030_s1 + $0x138] sm:$0xff]  ;;  %v333_v49 = vld [vmem:[%s2030_s1 + $0x1c0] sm:$0xff]  ;;  %v334_v50 = vld [vmem:[%s2030_s1 + $0x1c8] sm:$0xff]  ;;  %v1196_v52 = vpack.c.bf16 %v302_v47, %v301_v46 }
  0x19   : > { %1191 = vmatpush3.bf16.msra.mxu0 %v1190_v33  ;;  %v1226_v51 = vpack.c.bf16 %v316_v45, %v315_v44  ;;  %v285_v53 = vld [vmem:[%s2030_s1 + $0x40] sm:$0xff]  ;;  %v286_v54 = vld [vmem:[%s2030_s1 + $0x48] sm:$0xff]  ;;  %v1228_v56 = vpack.c.bf16 %v334_v50, %v333_v49  ;;  %v303_v58 = vld [vmem:[%s2030_s1 + $0xd0] sm:$0xff] }
  0x1a   : > { %1193 = vmatprep.subr.bf16.mxu0 %v1192_v39  ;;  %v317_v55 = vld [vmem:[%s2030_s1 + $0x140] sm:$0xff]  ;;  %v318_v57 = vld [vmem:[%s2030_s1 + $0x148] sm:$0xff]  ;;  %v304_v59 = vld [vmem:[%s2030_s1 + $0xd8] sm:$0xff]  ;;  %v1198_v62 = vpack.c.bf16 %v286_v54, %v285_v53 }
  0x1b   : > { %1223 = vmatpush3.bf16.msra.mxu1 %v1222_v38  ;;  %v335_v60 = vld [vmem:[%s2030_s1 + $0x1d0] sm:$0xff]  ;;  %v336_v61 = vld [vmem:[%s2030_s1 + $0x1d8] sm:$0xff]  ;;  %v1230_v63 = vpack.c.bf16 %v318_v57, %v317_v55  ;;  %v1200_v0 = vpack.c.bf16 %v304_v59, %v303_v58  ;;  %v305_v6 = vld [vmem:[%s2030_s1 + $0xe0] sm:$0xff] }
  0x1c   : > { %1225 = vmatprep.subr.bf16.mxu1 %v1224_v43  ;;  %v287_v1 = vld [vmem:[%s2030_s1 + $0x50] sm:$0xff]  ;;  %v288_v2 = vld [vmem:[%s2030_s1 + $0x58] sm:$0xff]  ;;  %v1232_v4 = vpack.c.bf16 %v336_v61, %v335_v60  ;;  %v306_v7 = vld [vmem:[%s2030_s1 + $0xe8] sm:$0xff] }
  0x1d   : > { %1195 = vmatpush3.bf16.msra.mxu0 %v1194_v48  ;;  %v319_v3 = vld [vmem:[%s2030_s1 + $0x150] sm:$0xff]  ;;  %v320_v5 = vld [vmem:[%s2030_s1 + $0x158] sm:$0xff]  ;;  %v337_v8 = vld [vmem:[%s2030_s1 + $0x1e0] sm:$0xff]  ;;  %v1202_v10 = vpack.c.bf16 %v288_v2, %v287_v1  ;;  %v1204_v14 = vpack.c.bf16 %v306_v7, %v305_v6 }
  0x1e   : > { %1197 = vmatprep.subr.bf16.mxu0 %v1196_v52  ;;  %v338_v9 = vld [vmem:[%s2030_s1 + $0x1e8] sm:$0xff]  ;;  %v289_v11 = vld [vmem:[%s2030_s1 + $0x60] sm:$0xff]  ;;  %v1234_v13 = vpack.c.bf16 %v320_v5, %v319_v3  ;;  %v307_v19 = vld [vmem:[%s2030_s1 + $0xf0] sm:$0xff] }
  0x1f   : > { %1227 = vmatpush3.bf16.msra.mxu1 %v1226_v51  ;;  %v290_v12 = vld [vmem:[%s2030_s1 + $0x68] sm:$0xff]  ;;  %v321_v15 = vld [vmem:[%s2030_s1 + $0x160] sm:$0xff]  ;;  %v1236_v18 = vpack.c.bf16 %v338_v9, %v337_v8  ;;  %v308_v20 = vld [vmem:[%s2030_s1 + $0xf8] sm:$0xff] }
  0x20   : > { %1229 = vmatprep.subr.bf16.mxu1 %v1228_v56  ;;  %v322_v16 = vld [vmem:[%s2030_s1 + $0x168] sm:$0xff]  ;;  %v229_v17 = vld [vmem:[%s1685_s23] sm:$0xff]  ;;  %v339_v23 = vld [vmem:[%s2030_s1 + $0x1f0] sm:$0xff]  ;;  %v1206_v26 = vpack.c.bf16 %v290_v12, %v289_v11  ;;  %v1208_v28 = vpack.c.bf16 %v308_v20, %v307_v19 }
  0x21   : > { %1199 = vmatpush3.bf16.msra.mxu0 %v1198_v62  ;;  %v246_v21 = vunpack.c.h.bf16 %v229_v17  ;;  %v230_v22 = vld [vmem:[%s1685_s23 + $0x8] sm:$0xff]  ;;  %v340_v24 = vld [vmem:[%s2030_s1 + $0x1f8] sm:$0xff]  ;;  %v1238_v27 = vpack.c.bf16 %v322_v16, %v321_v15  ;;  %v291_v29 = vld [vmem:[%s2030_s1 + $0x70] sm:$0xff]  ;;  %v245_v48 = vunpack.c.l.bf16 %v229_v17 }
  0x22   : > { %1201 = vmatprep.subr.bf16.mxu0 %v1200_v0  ;;  %v248_v25 = vunpack.c.h.bf16 %v230_v22  ;;  %v292_v30 = vld [vmem:[%s2030_s1 + $0x78] sm:$0xff]  ;;  %v323_v31 = vld [vmem:[%s2030_s1 + $0x170] sm:$0xff]  ;;  %v1240_v32 = vpack.c.bf16 %v340_v24, %v339_v23  ;;  %v357_v34 = vld [vmem:[%s2030_s1 + $0x280] sm:$0xff]  ;;  %v247_v51 = vunpack.c.l.bf16 %v230_v22 }
  0x23   : > { %1231 = vmatpush3.bf16.msra.mxu1 %v1230_v63  ;;  %476 = vmatprep.mubr.f32.mxu0 %v246_v21  ;;  %v324_v33 = vld [vmem:[%s2030_s1 + $0x178] sm:$0xff]  ;;  %v358_v35 = vld [vmem:[%s2030_s1 + $0x288] sm:$0xff]  ;;  %v389_v36 = vld [vmem:[%s2030_s1 + $0x380] sm:$0xff]  ;;  %v1210_v38 = vpack.c.bf16 %v292_v30, %v291_v29 }
  0x24   : > { %1233 = vmatprep.subr.bf16.mxu1 %v1232_v4  ;;  %561 = vmatprep.mubr.f32.mxu1 %v248_v25  ;;  %v390_v37 = vld [vmem:[%s2030_s1 + $0x388] sm:$0xff]  ;;  %v1242_v39 = vpack.c.bf16 %v324_v33, %v323_v31  ;;  %v1244_v40 = vpack.c.bf16 %v358_v35, %v357_v34  ;;  %v341_v41 = vld [vmem:[%s2030_s1 + $0x200] sm:$0xff]  ;;  %v359_v46 = vld [vmem:[%s2030_s1 + $0x290] sm:$0xff] }
  0x25   : > { %1203 = vmatpush3.bf16.msra.mxu0 %v1202_v10  ;;  %v342_v42 = vld [vmem:[%s2030_s1 + $0x208] sm:$0xff]  ;;  %v373_v43 = vld [vmem:[%s2030_s1 + $0x300] sm:$0xff]  ;;  %v1276_v44 = vpack.c.bf16 %v390_v37, %v389_v36  ;;  %v360_v47 = vld [vmem:[%s2030_s1 + $0x298] sm:$0xff] }
  0x26   : > { %1205 = vmatprep.subr.bf16.mxu0 %v1204_v14  ;;  %v374_v45 = vld [vmem:[%s2030_s1 + $0x308] sm:$0xff]  ;;  %v391_v49 = vld [vmem:[%s2030_s1 + $0x390] sm:$0xff]  ;;  %v392_v50 = vld [vmem:[%s2030_s1 + $0x398] sm:$0xff]  ;;  %v1246_v52 = vpack.c.bf16 %v342_v42, %v341_v41  ;;  %v1248_v55 = vpack.c.bf16 %v360_v47, %v359_v46 }
  0x27   : > { %1235 = vmatpush3.bf16.msra.mxu1 %v1234_v13  ;;  %v343_v53 = vld [vmem:[%s2030_s1 + $0x210] sm:$0xff]  ;;  %v1278_v54 = vpack.c.bf16 %v374_v45, %v373_v43  ;;  %v344_v56 = vld [vmem:[%s2030_s1 + $0x218] sm:$0xff]  ;;  %v1280_v59 = vpack.c.bf16 %v392_v50, %v391_v49  ;;  %v361_v60 = vld [vmem:[%s2030_s1 + $0x2a0] sm:$0xff] }
  0x28   : > { %1237 = vmatprep.subr.bf16.mxu1 %v1236_v18  ;;  %v375_v57 = vld [vmem:[%s2030_s1 + $0x310] sm:$0xff]  ;;  %v376_v58 = vld [vmem:[%s2030_s1 + $0x318] sm:$0xff]  ;;  %v362_v61 = vld [vmem:[%s2030_s1 + $0x2a8] sm:$0xff]  ;;  %v1250_v4 = vpack.c.bf16 %v344_v56, %v343_v53 }
  0x29   : > { %1207 = vmatpush3.bf16.msra.mxu0 %v1206_v26  ;;  %v233_v62 = vld [vmem:[%s1685_s23 + $0x20] sm:$0xff]  ;;  %v394_v0 = vld [vmem:[%s2030_s1 + $0x3a8] sm:$0xff]  ;;  %v1282_v8 = vpack.c.bf16 %v376_v58, %v375_v57  ;;  %v1252_v9 = vpack.c.bf16 %v362_v61, %v361_v60  ;;  %v363_v14 = vld [vmem:[%s2030_s1 + $0x2b0] sm:$0xff] }
  0x2a   : > { %1209 = vmatprep.subr.bf16.mxu0 %v1208_v28  ;;  %v393_v63 = vld [vmem:[%s2030_s1 + $0x3a0] sm:$0xff]  ;;  %v254_v1 = vunpack.c.h.bf16 %v233_v62  ;;  %v253_v2 = vunpack.c.l.bf16 %v233_v62  ;;  %v234_v3 = vld [vmem:[%s1685_s23 + $0x28] sm:$0xff]  ;;  %v364_v15 = vld [vmem:[%s2030_s1 + $0x2b8] sm:$0xff] }
  0x2b   : > { %1239 = vmatpush3.bf16.msra.mxu1 %v1238_v27  ;;  %v345_v5 = vld [vmem:[%s2030_s1 + $0x220] sm:$0xff]  ;;  %v256_v6 = vunpack.c.h.bf16 %v234_v3  ;;  %v255_v7 = vunpack.c.l.bf16 %v234_v3  ;;  %v346_v10 = vld [vmem:[%s2030_s1 + $0x228] sm:$0xff]  ;;  %v1284_v13 = vpack.c.bf16 %v394_v0, %v393_v63  ;;  %v395_v17 = vld [vmem:[%s2030_s1 + $0x3b0] sm:$0xff]  ;;  %v1256_v28 = vpack.c.bf16 %v364_v15, %v363_v14 }
  0x2c   : > { %1241 = vmatprep.subr.bf16.mxu1 %v1240_v32  ;;  %v377_v11 = vld [vmem:[%s2030_s1 + $0x320] sm:$0xff]  ;;  %v378_v12 = vld [vmem:[%s2030_s1 + $0x328] sm:$0xff]  ;;  %v396_v18 = vld [vmem:[%s2030_s1 + $0x3b8] sm:$0xff]  ;;  %v1254_v22 = vpack.c.bf16 %v346_v10, %v345_v5 }
  0x2d   : > { %1211 = vmatpush3.bf16.msra.mxu0 %v1210_v38  ;;  %v237_v16 = vld [vmem:[%s1685_s23 + $0x40] sm:$0xff]  ;;  %v238_v21 = vld [vmem:[%s1685_s23 + $0x48] sm:$0xff]  ;;  %v347_v23 = vld [vmem:[%s2030_s1 + $0x230] sm:$0xff]  ;;  %v1286_v27 = vpack.c.bf16 %v378_v12, %v377_v11  ;;  %v1288_v32 = vpack.c.bf16 %v396_v18, %v395_v17 }
  0x2e   : > { %1245 = vmatprep.subr.bf16.mxu0 %v1244_v40  ;;  %v262_v19 = vunpack.c.h.bf16 %v237_v16  ;;  %v261_v20 = vunpack.c.l.bf16 %v237_v16  ;;  %v348_v24 = vld [vmem:[%s2030_s1 + $0x238] sm:$0xff]  ;;  %v264_v25 = vunpack.c.h.bf16 %v238_v21  ;;  %v263_v26 = vunpack.c.l.bf16 %v238_v21  ;;  %v379_v29 = vld [vmem:[%s2030_s1 + $0x330] sm:$0xff]  ;;  %v241_v31 = vld [vmem:[%s1685_s23 + $0x60] sm:$0xff] }
  0x2f   : > { %1243 = vmatpush3.bf16.msra.mxu1 %v1242_v39  ;;  %v380_v30 = vld [vmem:[%s2030_s1 + $0x338] sm:$0xff]  ;;  %v365_v33 = vld [vmem:[%s2030_s1 + $0x2c0] sm:$0xff]  ;;  %v366_v34 = vld [vmem:[%s2030_s1 + $0x2c8] sm:$0xff]  ;;  %v270_v35 = vunpack.c.h.bf16 %v241_v31  ;;  %v269_v39 = vunpack.c.l.bf16 %v241_v31  ;;  %v1258_v41 = vpack.c.bf16 %v348_v24, %v347_v23 }
  0x30   : > { %1277 = vmatprep.subr.bf16.mxu1 %v1276_v44  ;;  %477 = vmatmul.mubr.f32.vlgmr.msra.gmra.mrb[0].mxu0 %v245_v48  ;;  %v242_v36 = vld [vmem:[%s1685_s23 + $0x68] sm:$0xff]  ;;  %v397_v37 = vld [vmem:[%s2030_s1 + $0x3c0] sm:$0xff]  ;;  %v1290_v45 = vpack.c.bf16 %v380_v30, %v379_v29  ;;  %v1260_v46 = vpack.c.bf16 %v366_v34, %v365_v33  ;;  %v1855_v48 = vld [vmem:[%s1685_s23 + $0x10] sm:$0xff] }
  0x31   : > { %1247 = vmatpush3.bf16.msra.mxu0 %v1246_v52  ;;  %481 = vmatprep.mubr.f32.mxu0 %v254_v1  ;;  %v398_v38 = vld [vmem:[%s2030_s1 + $0x3c8] sm:$0xff]  ;;  %v272_v40 = vunpack.c.h.bf16 %v242_v36  ;;  %v349_v42 = vld [vmem:[%s2030_s1 + $0x240] sm:$0xff]  ;;  %v271_v44 = vunpack.c.l.bf16 %v242_v36  ;;  %v1858_v49 = vld [vmem:[%s1685_s23 + $0x18] sm:$0xff]  ;;  %v249_v30 = vunpack.c.l.bf16 %v1855_v48 }
  0x32   : > { %562 = vmatmul.mubr.f32.vlgmr.msra.gmra.mrb[0].mxu1 %v247_v51  ;;  %1249 = vmatprep.subr.bf16.mxu0 %v1248_v55  ;;  %v350_v43 = vld [vmem:[%s2030_s1 + $0x248] sm:$0xff]  ;;  %v381_v47 = vld [vmem:[%s2030_s1 + $0x340] sm:$0xff]  ;;  %v1292_v50 = vpack.c.bf16 %v398_v38, %v397_v37  ;;  %v367_v52 = vld [vmem:[%s2030_s1 + $0x2d0] sm:$0xff]  ;;  %v252_v57 = vunpack.c.h.bf16 %v1858_v49  ;;  %v251_v31 = vunpack.c.l.bf16 %v1858_v49 }
  0x33   : > { %1279 = vmatpush3.bf16.msra.mxu1 %v1278_v54  ;;  %566 = vmatprep.mubr.f32.mxu1 %v256_v6  ;;  %v382_v51 = vld [vmem:[%s2030_s1 + $0x348] sm:$0xff]  ;;  %v368_v53 = vld [vmem:[%s2030_s1 + $0x2d8] sm:$0xff]  ;;  %v250_v54 = vunpack.c.h.bf16 %v1855_v48  ;;  %v399_v55 = vld [vmem:[%s2030_s1 + $0x3d0] sm:$0xff]  ;;  %v1262_v58 = vpack.c.bf16 %v350_v43, %v349_v42 }
  0x34   : > { %1281 = vmatprep.subr.bf16.mxu1 %v1280_v59  ;;  %482 = vmatmul.mubr.f32.gmra.mrb[2].mxu0 %v253_v2  ;;  %v400_v56 = vld [vmem:[%s2030_s1 + $0x3d8] sm:$0xff]  ;;  %v1294_v59 = vpack.c.bf16 %v382_v51, %v381_v47  ;;  %v1264_v60 = vpack.c.bf16 %v368_v53, %v367_v52  ;;  %v351_v61 = vld [vmem:[%s2030_s1 + $0x250] sm:$0xff]  ;;  %v369_v2 = vld [vmem:[%s2030_s1 + $0x2e0] sm:$0xff] }
  0x35   : > { %1251 = vmatpush3.bf16.msra.mxu0 %v1250_v4  ;;  %486 = vmatprep.mubr.f32.mxu0 %v262_v19  ;;  %v352_v62 = vld [vmem:[%s2030_s1 + $0x258] sm:$0xff]  ;;  %v383_v63 = vld [vmem:[%s2030_s1 + $0x350] sm:$0xff]  ;;  %v1296_v0 = vpack.c.bf16 %v400_v56, %v399_v55  ;;  %v370_v3 = vld [vmem:[%s2030_s1 + $0x2e8] sm:$0xff] }
  0x36   : > { %567 = vmatmul.mubr.f32.gmra.mrb[2].mxu1 %v255_v7  ;;  %1253 = vmatprep.subr.bf16.mxu0 %v1252_v9  ;;  %v384_v1 = vld [vmem:[%s2030_s1 + $0x358] sm:$0xff]  ;;  %v401_v4 = vld [vmem:[%s2030_s1 + $0x3e0] sm:$0xff]  ;;  %v402_v5 = vld [vmem:[%s2030_s1 + $0x3e8] sm:$0xff]  ;;  %v1266_v6 = vpack.c.bf16 %v352_v62, %v351_v61 }
  0x37   : > { %1283 = vmatpush3.bf16.msra.mxu1 %v1282_v8  ;;  %571 = vmatprep.mubr.f32.mxu1 %v264_v25  ;;  %v1298_v7 = vpack.c.bf16 %v384_v1, %v383_v63  ;;  %v1268_v8 = vpack.c.bf16 %v370_v3, %v369_v2  ;;  %v353_v9 = vld [vmem:[%s2030_s1 + $0x260] sm:$0xff]  ;;  %v354_v10 = vld [vmem:[%s2030_s1 + $0x268] sm:$0xff]  ;;  %v1300_v12 = vpack.c.bf16 %v402_v5, %v401_v4  ;;  %v371_v14 = vld [vmem:[%s2030_s1 + $0x2f0] sm:$0xff] }
  0x38   : > { %1285 = vmatprep.subr.bf16.mxu1 %v1284_v13  ;;  %487 = vmatmul.mubr.f32.gmra.mrb[4].mxu0 %v261_v20  ;;  %v385_v11 = vld [vmem:[%s2030_s1 + $0x360] sm:$0xff]  ;;  %v386_v13 = vld [vmem:[%s2030_s1 + $0x368] sm:$0xff]  ;;  %v372_v15 = vld [vmem:[%s2030_s1 + $0x2f8] sm:$0xff]  ;;  %v1270_v18 = vpack.c.bf16 %v354_v10, %v353_v9 }
  0x39   : > { %1255 = vmatpush3.bf16.msra.mxu0 %v1254_v22  ;;  %491 = vmatprep.mubr.f32.mxu0 %v270_v35  ;;  %v403_v16 = vld [vmem:[%s2030_s1 + $0x3f0] sm:$0xff]  ;;  %v404_v17 = vld [vmem:[%s2030_s1 + $0x3f8] sm:$0xff]  ;;  %v1302_v19 = vpack.c.bf16 %v386_v13, %v385_v11  ;;  %v1272_v20 = vpack.c.bf16 %v372_v15, %v371_v14  ;;  %v756_v48 = vld [vmem:[%s2032_s3] sm:$0xff] }
  0x3a   : > { %572 = vmatmul.mubr.f32.gmra.mrb[4].mxu1 %v263_v26  ;;  %1257 = vmatprep.subr.bf16.mxu0 %v1256_v28  ;;  %v355_v21 = vld [vmem:[%s2030_s1 + $0x270] sm:$0xff]  ;;  %v356_v22 = vld [vmem:[%s2030_s1 + $0x278] sm:$0xff]  ;;  %v1304_v23 = vpack.c.bf16 %v404_v17, %v403_v16  ;;  %v757_v49 = vld [vmem:[%s2032_s3 + $0x8] sm:$0xff] }
  0x3b   : > { %1287 = vmatpush3.bf16.msra.mxu1 %v1286_v27  ;;  %576 = vmatprep.mubr.f32.mxu1 %v272_v40  ;;  %v387_v24 = vld [vmem:[%s2030_s1 + $0x370] sm:$0xff]  ;;  %v388_v25 = vld [vmem:[%s2030_s1 + $0x378] sm:$0xff]  ;;  %v1274_v26 = vpack.c.bf16 %v356_v22, %v355_v21  ;;  %v761_v55 = vld [vmem:[%s2032_s3 + $0x28] sm:$0xff] }
  0x3c   : > { %1289 = vmatprep.subr.bf16.mxu1 %v1288_v32  ;;  %492 = vmatmul.mubr.f32.gmra.mrb[6].mxu0 %v269_v39  ;;  %v1306_v27 = vpack.c.bf16 %v388_v25, %v387_v24  ;;  %v235_v28 = vld [vmem:[%s1685_s23 + $0x30] sm:$0xff]  ;;  %v236_v29 = vld [vmem:[%s1685_s23 + $0x38] sm:$0xff]  ;;  %v957_v61 = vld [vmem:[%s2031_s2] ss:$0 sm:$0xff] }
  0x3d   : > { %1259 = vmatpush3.bf16.msra.mxu0 %v1258_v41  ;;  %646 = vmatprep.mubr.f32.mxu0 %v250_v54  ;;  %v258_v32 = vunpack.c.h.bf16 %v235_v28  ;;  %v260_v33 = vunpack.c.h.bf16 %v236_v29  ;;  %v239_v34 = vld [vmem:[%s1685_s23 + $0x50] sm:$0xff]  ;;  %v240_v35 = vld [vmem:[%s1685_s23 + $0x58] sm:$0xff]  ;;  %v257_v36 = vunpack.c.l.bf16 %v235_v28  ;;  %v259_v37 = vunpack.c.l.bf16 %v236_v29  ;;  %v760_v54 = vld [vmem:[%s2032_s3 + $0x20] sm:$0xff] }
  0x3e   : > { %577 = vmatmul.mubr.f32.gmra.mrb[6].mxu1 %v271_v44  ;;  %1261 = vmatprep.subr.bf16.mxu0 %v1260_v46  ;;  %v266_v38 = vunpack.c.h.bf16 %v239_v34  ;;  %v268_v39 = vunpack.c.h.bf16 %v240_v35  ;;  %v243_v40 = vld [vmem:[%s1685_s23 + $0x70] sm:$0xff]  ;;  %v244_v41 = vld [vmem:[%s1685_s23 + $0x78] sm:$0xff]  ;;  %v265_v42 = vunpack.c.l.bf16 %v239_v34  ;;  %v267_v43 = vunpack.c.l.bf16 %v240_v35  ;;  %s218_s23 = sand.u32 1, %s1427_s19  }
  0x3f   : > { %1291 = vmatpush3.bf16.msra.mxu1 %v1290_v45  ;;  %731 = vmatprep.mubr.f32.mxu1 %v252_v57  ;;  %v274_v44 = vunpack.c.h.bf16 %v243_v40  ;;  %v276_v45 = vunpack.c.h.bf16 %v244_v41  ;;  %v273_v46 = vunpack.c.l.bf16 %v243_v40  ;;  %v275_v47 = vunpack.c.l.bf16 %v244_v41  ;;  %v758_v51 = vld [vmem:[%s2032_s3 + $0x10] sm:$0xff]  ;;  %v759_v52 = vld [vmem:[%s2032_s3 + $0x18] sm:$0xff]  ;;  %s953_s26 = sshll.u32 %s218_s23, 5  ;;  %s1988_s6 = scalar_lea.sflag [#allocation3], %s218_s23 }
  0x40   : > { %1293 = vmatprep.subr.bf16.mxu1 %v1292_v50  ;;  %v1308_v50 = vpack.c.bf16 %v757_v49, %v756_v48  ;;  %v1312_v53 = vpack.c.bf16 %v759_v52, %v758_v51  ;;  %v1316_v56 = vpack.c.bf16 %v761_v55, %v760_v54  ;;  %v762_v57 = vld [vmem:[%s2032_s3 + $0x30] sm:$0xff]  ;;  %s220_s14 = scalar_lea.vmem [#allocation2], %s953_s26 }
  0x41   : > { %1263 = vmatpush3.bf16.msra.mxu0 %v1262_v58  ;;  %v763_v58 = vld [vmem:[%s2032_s3 + $0x38] sm:$0xff]  ;;  %s887_s15 = sshll.u32 %s220_s14, 4  ;;  %s1981_s15 = int_to_ptr.vmem [resolvable:$true] %s887_s15 }
  0x42   : > { %1265 = vmatprep.subr.bf16.mxu0 %v1264_v60  ;;  %s1373_s8 = scalar_lea.vmem %s1981_s15, 512  ;;  %p1380_p0 = scmp.lt.s32.totalorder %s1981_s15, %s1378_s9 }
  0x43   : > { %1295 = vmatpush3.bf16.msra.mxu1 %v1294_v59  ;;  %v1320_v59 = vpack.c.bf16 %v763_v58, %v762_v57  ;;  %p1374_p11 = scmp.ne.s32.totalorder %s1981_s15, %s1373_s8  ;;  %p1381_p1 = scmp.lt.s32.totalorder %s1379_s10, %s1373_s8 }
  0x44   : > { %1297 = vmatprep.subr.bf16.mxu1 %v1296_v0 }
  0x45   : > { %1267 = vmatpush3.bf16.msra.mxu0 %v1266_v6  ;;  %p1375_p12 = pnand %p1374_p11, %p1508_p5  ;;  %p1382_p2 = por %p1381_p1, %p1380_p0 }
  0x46   : > { %1269 = vmatprep.subr.bf16.mxu0 %v1268_v8 }
  0x47   : > { %1299 = vmatpush3.bf16.msra.mxu1 %v1298_v7  ;;  %p1376_p13 = pneg %p1375_p12 }
  0x48   : > { %1301 = vmatprep.subr.bf16.mxu1 %v1300_v12 }
  0x49   : > { %1271 = vmatpush3.bf16.msra.mxu0 %v1270_v18  ;;  %p1383_p3 = pnand %p1382_p2, %p1376_p13 }
  0x4a   : > { %1273 = vmatprep.subr.bf16.mxu0 %v1272_v20 }
  0x4b   : > { %1303 = vmatpush3.bf16.msra.mxu1 %v1302_v19 }
  0x4c   : > { %1305 = vmatprep.subr.bf16.mxu1 %v1304_v23 }
  0x4d   : > { %1275 = vmatpush3.bf16.msra.mxu0 %v1274_v26 }
  0x4e   : > { %1309 = vmatprep.subr.bf16.mxu0 %v1308_v50 }
  0x4f   : > { %1307 = vmatpush3.bf16.msra.mxu1 %v1306_v27 }
  0x50   : > { %647 = vmatmul.mubr.f32.vlgmr.msra.gmra.mrb[8].mxu0 %v249_v30  ;;  %1324 = vmatprep.subr.bf16.mxu1 %v1308_v50 }
  0x51   : > { %651 = vmatprep.mubr.f32.mxu0 %v258_v32  ;;  %1311 = vmatpush3.bf16.msra.mxu0 %v1308_v50 }
  0x52   : > { %732 = vmatmul.mubr.f32.vlgmr.msra.gmra.mrb[8].mxu1 %v251_v31  ;;  %1313 = vmatprep.subr.bf16.mxu0 %v1312_v53 }
  0x53   : > { %736 = vmatprep.mubr.f32.mxu1 %v260_v33  ;;  %1328 = vmatpush3.bf16.msra.mxu1 %v1308_v50 }
  0x54   : > { %652 = vmatmul.mubr.f32.gmra.mrb[10].mxu0 %v257_v36  ;;  %1325 = vmatprep.subr.bf16.mxu1 %v1312_v53 }
  0x55   : > { %656 = vmatprep.mubr.f32.mxu0 %v266_v38  ;;  %1315 = vmatpush3.bf16.msra.mxu0 %v1312_v53 }
  0x56   : > { %737 = vmatmul.mubr.f32.gmra.mrb[10].mxu1 %v259_v37  ;;  %1317 = vmatprep.subr.bf16.mxu0 %v1316_v56 }
  0x57   : > { %741 = vmatprep.mubr.f32.mxu1 %v268_v39  ;;  %1329 = vmatpush3.bf16.msra.mxu1 %v1312_v53 }
  0x58   : > { %657 = vmatmul.mubr.f32.gmra.mrb[12].mxu0 %v265_v42  ;;  %1326 = vmatprep.subr.bf16.mxu1 %v1316_v56 }
  0x59   : > { %661 = vmatprep.mubr.f32.mxu0 %v274_v44  ;;  %1319 = vmatpush3.bf16.msra.mxu0 %v1316_v56 }
  0x5a   : > { %742 = vmatmul.mubr.f32.gmra.mrb[12].mxu1 %v267_v43  ;;  %1321 = vmatprep.subr.bf16.mxu0 %v1320_v59 }
  0x5b   : > { %746 = vmatprep.mubr.f32.mxu1 %v276_v45  ;;  %1330 = vmatpush3.bf16.msra.mxu1 %v1316_v56 }
  0x5c   : > { %662 = vmatmul.mubr.f32.gmra.mrb[14].mxu0 %v273_v46  ;;  %1327 = vmatprep.subr.bf16.mxu1 %v1320_v59 }
  0x5d   : > { %1323 = vmatpush3.bf16.msra.mxu0 %v1320_v59 }
  0x5e   : > { %747 = vmatmul.mubr.f32.gmra.mrb[14].mxu1 %v275_v47 }
  0x5f   : > { %1331 = vmatpush3.bf16.msra.mxu1 %v1320_v59 }
 0x103   : > { %v1002_v60 = vpop.f32.mrb[0].mxu0 }
 0x104   : > { %v1003_v62 = vpop.f32.mrb[1].mxu0 }
 0x105   : > { %v1046_v63 = vpop.f32.mrb[0].mxu1  ;;  %v1004_v0 = vadd.f32 %v1003_v62, %v1002_v60 }
 0x106   : > { %v1047_v1 = vpop.f32.mrb[1].mxu1 }
 0x107   : > { %v1048_v2 = vadd.f32 %v1047_v1, %v1046_v63  ;;  %v479_v3 = vadd.f32 %v1004_v0, %v957_v61  ;;  %v1005_v4 = vpop.f32.mrb[2].mxu0  ;;  %v958_v1 = vld [vmem:[%s2033_s4] ss:$0 sm:$0xff] }
 0x108   : > { %v1006_v5 = vpop.f32.mrb[3].mxu0 }
 0x109   : > { %v1049_v6 = vpop.f32.mrb[2].mxu1  ;;  %v564_v7 = vadd.f32 %v1048_v2, %v479_v3  ;;  %v1007_v8 = vadd.f32 %v1006_v5, %v1005_v4 }
 0x10a   : > { %v1050_v9 = vpop.f32.mrb[3].mxu1 }
 0x10b   : > { %v1051_v10 = vadd.f32 %v1050_v9, %v1049_v6  ;;  %v484_v11 = vadd.f32 %v1007_v8, %v957_v61  ;;  %v1008_v12 = vpop.f32.mrb[4].mxu0 }
 0x10c   : > { %v1009_v13 = vpop.f32.mrb[5].mxu0 }
 0x10d   : > { %v1052_v14 = vpop.f32.mrb[4].mxu1  ;;  %v569_v15 = vadd.f32 %v1051_v10, %v484_v11  ;;  %v1010_v16 = vadd.f32 %v1009_v13, %v1008_v12 }
 0x10e   : > { %v1053_v17 = vpop.f32.mrb[5].mxu1 }
 0x10f   : > { %v1054_v18 = vadd.f32 %v1053_v17, %v1052_v14  ;;  %v489_v19 = vadd.f32 %v1010_v16, %v957_v61  ;;  %v1011_v20 = vpop.f32.mrb[6].mxu0 }
 0x110   : > { %v1012_v21 = vpop.f32.mrb[7].mxu0 }
 0x111   : > { %v1055_v22 = vpop.f32.mrb[6].mxu1  ;;  %v574_v23 = vadd.f32 %v1054_v18, %v489_v19  ;;  %v1013_v24 = vadd.f32 %v1012_v21, %v1011_v20 }
 0x112   : > { %v1056_v25 = vpop.f32.mrb[7].mxu1 }
 0x113   : > { %v1057_v26 = vadd.f32 %v1056_v25, %v1055_v22  ;;  %v494_v27 = vadd.f32 %v1013_v24, %v957_v61 }
 0x115   : > { %v579_v28 = vadd.f32 %v1057_v26, %v494_v27 }
 0x123   : > { %v1090_v29 = vpop.f32.mrb[8].mxu0 }
 0x124   : > { %v1091_v30 = vpop.f32.mrb[9].mxu0 }
 0x125   : > { %v1134_v31 = vpop.f32.mrb[8].mxu1  ;;  %v1092_v32 = vadd.f32 %v1091_v30, %v1090_v29 }
 0x126   : > { %v1135_v33 = vpop.f32.mrb[9].mxu1 }
 0x127   : > { %v1136_v34 = vadd.f32 %v1135_v33, %v1134_v31  ;;  %v649_v35 = vadd.f32 %v1092_v32, %v564_v7  ;;  %v1093_v36 = vpop.f32.mrb[10].mxu0 }
 0x128   : > { %v1094_v37 = vpop.f32.mrb[11].mxu0 }
 0x129   : > { %v1137_v38 = vpop.f32.mrb[10].mxu1  ;;  %v734_v39 = vadd.f32 %v1136_v34, %v649_v35  ;;  %v1095_v40 = vadd.f32 %v1094_v37, %v1093_v36 }
 0x12a   : > { %v1138_v41 = vpop.f32.mrb[11].mxu1 }
 0x12b   : > { %v1139_v42 = vadd.f32 %v1138_v41, %v1137_v38  ;;  %v752_v43 = vmax.f32 %v734_v39, 0.0  ;;  %v654_v44 = vadd.f32 %v1095_v40, %v569_v15  ;;  %v1096_v45 = vpop.f32.mrb[12].mxu0 }
 0x12c   : > { %v1097_v46 = vpop.f32.mrb[13].mxu0 }
 0x12d   : > { %v1140_v47 = vpop.f32.mrb[12].mxu1  ;;  %v739_v48 = vadd.f32 %v1139_v42, %v654_v44  ;;  %v1098_v49 = vadd.f32 %v1097_v46, %v1096_v45  ;;  %1174 = vmatprep.mubr.msk.f32.mxu0 %vm771_vm0, %v752_v43 }
 0x12e   : > { %v1141_v50 = vpop.f32.mrb[13].mxu1 }
 0x12f   : > { %v1142_v51 = vadd.f32 %v1141_v50, %v1140_v47  ;;  %v753_v52 = vmax.f32 %v739_v48, 0.0  ;;  %v659_v53 = vadd.f32 %v1098_v49, %v574_v23  ;;  %v1099_v54 = vpop.f32.mrb[14].mxu0 }
 0x130   : > { %v1100_v55 = vpop.f32.mrb[15].mxu0 }
 0x131   : > { %v1143_v56 = vpop.f32.mrb[14].mxu1  ;;  %v744_v57 = vadd.f32 %v1142_v51, %v659_v53  ;;  %v1101_v58 = vadd.f32 %v1100_v55, %v1099_v54  ;;  %1175 = vmatmul.mubr.msk.f32.vlgmr.msra.gmra.mrb[16].mxu0 %vm771_vm0, %v753_v52 }
 0x132   : > { %v1144_v59 = vpop.f32.mrb[15].mxu1 }
 0x133   : > { %v1145_v60 = vadd.f32 %v1144_v59, %v1143_v56  ;;  %v754_v61 = vmax.f32 %v744_v57, 0.0  ;;  %v664_v62 = vadd.f32 %v1101_v58, %v579_v28 }
 0x135   : > { %v749_v63 = vadd.f32 %v1145_v60, %v664_v62  ;;  %1177 = vmatprep.mubr.msk.f32.mxu1 %vm771_vm0, %v754_v61 }
 0x137   : > { %v755_v0 = vmax.f32 %v749_v63, 0.0 }
 0x139   : > { %1178 = vmatmul.mubr.msk.f32.vlgmr.msra.gmra.mrb[16].mxu1 %vm771_vm0, %v755_v0 }
 0x204   : > { %v1176_v2 = vpop.f32.mrb[16].mxu0 }
 0x205   : > { %v856_v3 = vadd.f32 %v1176_v2, %v958_v1  ;;  %v850_v4 = vpop.f32.mrb[17].mxu0 }
 0x206   : > { %v851_v5 = vadd.f32 %v958_v1, %v850_v4 }
 0x207   : > { %870 = vst [vmem:[%s220_s14 + $0x8] sm:$0xff] %v856_v3 }
 0x208   : > { %869 = vst [vmem:[%s220_s14] sm:$0xff] %v851_v5 }
 0x20c   : > { %v1179_v6 = vpop.f32.mrb[16].mxu1 }
 0x20d   : > { %v866_v7 = vadd.f32 %v1179_v6, %v958_v1  ;;  %v860_v8 = vpop.f32.mrb[17].mxu1 }
 0x20e   : > { %v861_v9 = vadd.f32 %v958_v1, %v860_v8 }
 0x20f   : > { %872 = vst [vmem:[%s220_s14 + $0x18] sm:$0xff] %v866_v7 }
 0x210   : > { %871 = vst [vmem:[%s220_s14 + $0x10] sm:$0xff] %v861_v9 }
 0x211   : > { %1386 = shalt.err (!%p1383_p3)
}
 0x212   : > { %s1387_s25 = scalar_lea.hbm %s1986_s30, 512  ;;  %s1391_s26 = scalar_lea.hbm %s2034_s5, 1024 }
 0x213   : > { %p1388_p4 = scmp.ne.s32.totalorder %s1986_s30, %s1387_s25  ;;  %p1392_p9 = scmp.lt.u32.totalorder %s1986_s30, %s2034_s5 }
 0x214   : > { %p1393_p10 = scmp.lt.u32.totalorder %s1391_s26, %s1387_s25  ;;  %p1395_p12 = scmp.lt.u32.totalorder %s1387_s25, %s1986_s30 }
 0x215   : > { %p1389_p7 = pnand %p1388_p4, %p1508_p5 }
 0x216   : > { %p1394_p11 = por %p1393_p10, %p1392_p9 }
 0x217   : > { %p1390_p8 = pneg %p1389_p7 }
 0x218   : > { %p1396_p13 = por %p1395_p12, %p1394_p11 }
 0x21a   : > { %p1397_p0 = pnand %p1396_p13, %p1390_p8 }
 0x21c   : > { %1400 = shalt.err (!%p1397_p0)
}
 0x21d   : > { %s1438_s14 = smov 128   ;;  %s1439_s16 = smov 8  }
 0x21e   : > { %1332 = dma.vmem_to_hbm [thread:$0]  (%p1508_p5), %s1981_s15, 512, %s1986_s30, %s1988_s6, %s1438_s14, %s1438_s14, %s1439_s16  }
 0x21f PF: > { %p1338_p1 = scmp.ge.s32.totalorder %s1435_s21, 2  ;;  %s902_s17 = sand.u32 1, %s1423_s18  }
 0x220   : > { %s903_s7 = scalar_lea.sflag [#allocation3], %s902_s17 }
 0x221   : > { %p1335_p2 = pnand %p1338_p1, %p1512_p6 }
 0x223   : > { %1418 = dma.done.wait (!%p1335_p2), %s903_s7, 512  }
 0x224   : > { %1420 = vsyncadd (!%p1335_p2), %s903_s7, 4294966784  ;;  %p15_p3 = scmp.ge.s32.totalorder %s1495_s24, 4   ;;  %s2038_s18 = smov %s1427_s19 }
 0x225   : > { %s2039_s19 = smov %s1431_s20  ;;  %s2040_s20 = smov %s1506_s27 }
 0x226   : > { %s2041_s21 = smov %s1495_s24  ;;  %17 = sbr.rel (!%p15_p3) target bundleno = 3 (0x3), region = 75 }
 0x22d   :  { %908 = vsyncpa [#allocation3], 1 }
 0x22e   :  { %910 = vsyncpa [#allocation3 + $0x1], 1 }

</bundles_post_ra>
